<compile_context>
chip_gen: v6e
topology: v6e:2x2x1
jax: 0.10.0
libtpu: 0.0.40
codegen_flags: <defaults>
</compile_context>

<pallas_src>
import functools
import math

import jax
import jax.numpy as jnp
from jax.experimental import pallas as pl
from jax.experimental.pallas import tpu as pltpu

_EPS = 1e-30  # guards rsqrt(0) and garbage lanes of a ragged last weight tile


# ---------------------------------------------------------------------------
# Kernel: streamed cosine logits (origin = clip(cos, -1, 1) * s)
# ---------------------------------------------------------------------------
def _arcface_cos_kernel(*refs, s, has_inv_col):
    if has_inv_col:
        emb_ref, w_ref, inv_col_ref, origin_ref = refs
    else:
        emb_ref, w_ref, origin_ref = refs

    # Row-normalize the small (TB, D) embedding tile before the matmul
    # (B*D multiply instead of a (TB, TN) broadcast multiply afterwards).
    # rsqrt goes to the EUP slot -> ~free.
    emb = emb_ref[...].astype(jnp.float32)
    inv_row = jax.lax.rsqrt(
        jnp.maximum(jnp.sum(emb * emb, axis=1, keepdims=True), _EPS))
    emb_n = emb * inv_row                                          # (TB, D)

    w = w_ref[...]                                                 # (D, TN), stored dtype

    if has_inv_col:
        inv_col_s = inv_col_ref[...].astype(jnp.float32) * s       # (1, TN)
    else:
        # Column sum-of-squares on the MXU: ones(8, D) @ (w*w) with f32
        # accumulation.  Keeps the D-deep cross-sublane reduction off the
        # VPU/XLU and avoids a full (D, TN) f32 upcast of the streamed tile.
        ones = jnp.ones((8, w.shape[0]), dtype=w.dtype)
        colsumsq = jnp.dot(ones, w * w,
                           preferred_element_type=jnp.float32)[0:1, :]
        inv_col_s = jax.lax.rsqrt(jnp.maximum(colsumsq, _EPS)) * s

    # MXU matmul in the weight's stored dtype (bf16 weight -> bf16 matmul),
    # f32 accumulation.
    raw = jnp.dot(emb_n.astype(w.dtype), w,
                  preferred_element_type=jnp.float32)              # (TB, TN)

    # clip(cos, -1, 1) * s == clip(cos*s, -s, s): fold s into the (1, TN)
    # column scale so only one full-tile multiply + clip remains.
    origin_ref[...] = jnp.clip(raw * inv_col_s, -s, s).astype(origin_ref.dtype)


# ---------------------------------------------------------------------------
# Per-generation tile sizing
# ---------------------------------------------------------------------------
def _auto_tiling(B, D, N, w_itemsize, out_itemsize, block_n, block_b,
                 vmem_limit_bytes):
    if block_b is None:
        block_b = B if B <= 256 else 256          # multiple of 8 or full dim
    block_b = min(block_b, B)

    if vmem_limit_bytes is None:
        try:
            info = pltpu.get_tpu_info()
            phys = getattr(info, "vmem_capacity_bytes", None) or (128 << 20)
        except Exception:                          # CPU / interpret / old jax
            phys = 128 << 20
        # ~48 MiB on v7x (64 MiB physical), capped at 96 MiB on v5e/v6e.
        vmem_limit_bytes = min(int(phys * 3 // 4), 96 << 20)

    if block_n is None:
        budget = int(vmem_limit_bytes * 0.8)
        fixed = 2 * block_b * D * 4                       # resident emb (x2 buf)
        per_n = 2 * D * w_itemsize + 2 * block_b * out_itemsize + 2 * 4
        block_n = max(128, (budget - fixed) // max(per_n, 1))
        block_n = min(4096, (block_n // 128) * 128)

    block_n = min(block_n, pl.cdiv(N, 128) * 128)
    block_n = max(128, (block_n // 128) * 128)
    return int(block_n), int(block_b), int(vmem_limit_bytes)


# ---------------------------------------------------------------------------
# Wrapper
# ---------------------------------------------------------------------------
def arcface_forward(embeddings, weight, label, *, s=64.0, m=0.5,
                    easy_margin=False, block_n=None, block_b=None,
                    inv_col=None, out_dtype=jnp.float32,
                    vmem_limit_bytes=None):
    """ArcFace forward.

    embeddings: (B, D), weight: (D, N) (stream it as bf16 to halve weight HBM
    traffic), label: (B,) int32.  Optional inv_col: (N,) or (1, N) precomputed
    1/||w_col|| (skips the in-kernel column-norm pass).
    Returns (output, origin_cos * s), both (B, N) in out_dtype.
    """
    B, D = embeddings.shape
    D2, N = weight.shape
    assert D == D2
    cos_m, sin_m = math.cos(m), math.sin(m)
    th, mm = math.cos(math.pi - m), math.sin(math.pi - m) * m

    block_n, block_b, vmem_limit_bytes = _auto_tiling(
        B, D, N, jnp.dtype(weight.dtype).itemsize, jnp.dtype(out_dtype).itemsize,
        block_n, block_b, vmem_limit_bytes)
    grid_n = pl.cdiv(N, block_n)
    grid_b = pl.cdiv(B, block_b)

    has_inv_col = inv_col is not None
    kernel = functools.partial(_arcface_cos_kernel, s=s, has_inv_col=has_inv_col)

    # Grid: classes outer (weight tile DMA'd once per outer step), batch inner
    # (bounds output VMEM; emb block index repeats -> no re-DMA when grid_b==1).
    in_specs = [
        pl.BlockSpec((block_b, D), lambda j, i: (i, 0)),        # embeddings
        pl.BlockSpec((D, block_n), lambda j, i: (0, j)),        # weight (streamed)
    ]
    operands = [embeddings, weight]
    if has_inv_col:
        inv_col = jnp.asarray(inv_col, dtype=jnp.float32).reshape(1, N)
        in_specs.append(pl.BlockSpec((1, block_n), lambda j, i: (0, j)))
        operands.append(inv_col)

    origin = pl.pallas_call(
        kernel,
        out_shape=jax.ShapeDtypeStruct((B, N), out_dtype),
        grid_spec=pltpu.PrefetchScalarGridSpec(
            num_scalar_prefetch=0,
            grid=(grid_n, grid_b),
            in_specs=in_specs,
            out_specs=pl.BlockSpec((block_b, block_n), lambda j, i: (i, j)),
        ),
        compiler_params=pltpu.CompilerParams(
            dimension_semantics=("parallel", "parallel"),
            vmem_limit_bytes=vmem_limit_bytes,
        ),
    )(*operands)

    # ---- tiny per-row margin path (wrapper): gather the B label columns ----
    emb32 = embeddings.astype(jnp.float32)
    inv_row = jax.lax.rsqrt(
        jnp.maximum(jnp.sum(emb32 * emb32, axis=1, keepdims=True), _EPS))
    w_lab = jnp.take(weight, label, axis=1).astype(jnp.float32)      # (D, B)
    inv_col_lab = jax.lax.rsqrt(
        jnp.maximum(jnp.sum(w_lab * w_lab, axis=0), _EPS))           # (B,)
    target = jnp.sum((emb32 * inv_row) * w_lab.T, axis=1) * inv_col_lab
    target = jnp.clip(target, -1.0, 1.0)
    sin_t = jnp.sqrt(jnp.maximum(1.0 - target * target, 0.0))
    cos_theta_m = target * cos_m - sin_t * sin_m
    if easy_margin:
        final = jnp.where(target > 0.0, cos_theta_m, target)
    else:
        final = jnp.where(target > th, cos_theta_m, target - mm)

    # scatter_: replace the label column with the margin-adjusted logit.
    output = origin.at[jnp.arange(B), label].set((final * s).astype(out_dtype))
    return output, origin


# ---------------------------------------------------------------------------
# Pure-JAX reference (torch module semantics, non-Inception path)
# ---------------------------------------------------------------------------
def arcface_reference(embeddings, weight, label, *, s=64.0, m=0.5,
                      easy_margin=False):
    cos_m, sin_m = math.cos(m), math.sin(m)
    th, mm = math.cos(math.pi - m), math.sin(math.pi - m) * m
    emb_n = embeddings / jnp.linalg.norm(embeddings, axis=1, keepdims=True)
    w32 = weight.astype(jnp.float32)
    w_n = w32 / jnp.linalg.norm(w32, axis=0, keepdims=True)
    cos = jnp.clip(emb_n @ w_n, -1.0, 1.0)
    origin = cos
    target = cos[jnp.arange(cos.shape[0]), label][:, None]
    sin_t = jnp.sqrt(1.0 - target * target)
    cos_theta_m = target * cos_m - sin_t * sin_m
    if easy_margin:
        final = jnp.where(target > 0, cos_theta_m, target)
    else:
        final = jnp.where(target > th, cos_theta_m, target - mm)
    onehot = jax.nn.one_hot(label, cos.shape[1], dtype=bool)
    out = jnp.where(onehot, final, cos)
    return out * s, origin * s


if __name__ == "__main__":
    B, D, N = 8, 32, 512  # batch, in_features, out_features
    key = jax.random.PRNGKey(0)
    k_emb, k_w, k_lab = jax.random.split(key, 3)

    embeddings = jax.random.normal(k_emb, (B, D), dtype=jnp.float32)
    std = math.sqrt(2.0 / (D + N))            # xavier_normal_
    weight = jax.random.normal(k_w, (D, N), dtype=jnp.float32) * std
    label = jax.random.randint(k_lab, (B,), 0, N, dtype=jnp.int32)

    out_ref, origin_ref = arcface_reference(embeddings, weight, label)

    # 1) f32 weight, explicit block_n=128 -> 4 class tiles.
    out, origin = arcface_forward(embeddings, weight, label, block_n=128)
    jax.block_until_ready((out, origin))
    assert jnp.allclose(out, out_ref, atol=1e-3, rtol=1e-3)
    assert jnp.allclose(origin, origin_ref, atol=1e-3, rtol=1e-3)

    # 2) bf16-stored weight (no wrapper cast/pad copy; streamed as bf16).
    weight_bf16 = weight.astype(jnp.bfloat16)
    out_bf, origin_bf = arcface_forward(embeddings, weight_bf16, label,
                                        block_n=128)
    jax.block_until_ready((out_bf, origin_bf))
    assert jnp.allclose(out_bf, out_ref, atol=0.75, rtol=2e-2)
    assert jnp.allclose(origin_bf, origin_ref, atol=0.75, rtol=2e-2)

    # 3) ragged N (not a multiple of block_n): last tile partially OOB.
    N_r = 450
    weight_r = weight[:, :N_r]
    label_r = label % N_r
    out_ref_r, origin_ref_r = arcface_reference(embeddings, weight_r, label_r)
    out_r, origin_r = arcface_forward(embeddings, weight_r, label_r, block_n=128)
    jax.block_until_ready((out_r, origin_r))
    assert jnp.allclose(out_r, out_ref_r, atol=1e-3, rtol=1e-3)
    assert jnp.allclose(origin_r, origin_ref_r, atol=1e-3, rtol=1e-3)

    # 4) precomputed inv_col path + auto tiling (block_n=None).
    inv_col = jax.lax.rsqrt(jnp.sum(weight * weight, axis=0, keepdims=True))
    out_p, origin_p = arcface_forward(embeddings, weight, label, inv_col=inv_col)
    jax.block_until_ready((out_p, origin_p))
    assert jnp.allclose(out_p, out_ref, atol=1e-3, rtol=1e-3)
    assert jnp.allclose(origin_p, origin_ref, atol=1e-3, rtol=1e-3)

    print("KERNEL_OK")
</pallas_src>

<mosaic_0001>
module attributes {stable_mosaic.version = 11 : i64} {
  func.func @_arcface_cos_kernel(%arg0: i32, %arg1: i32, %arg2: memref<8x32xf32, #tpu.memory_space<vmem>>, %arg3: memref<32x128xf32, #tpu.memory_space<vmem>>, %arg4: memref<8x128xf32, #tpu.memory_space<vmem>>) attributes {dimension_semantics = [#tpu.dimension_semantics<parallel>, #tpu.dimension_semantics<parallel>], iteration_bounds = array<i64: 4, 1>, scalar_prefetch = 0 : i64, scratch_operands = 0 : i64, tpu.core_type = #tpu.core_type<tc>, window_params = [{transform_indices = @transform_0, window_bounds = array<i64: 8, 32>}, {transform_indices = @transform_1, window_bounds = array<i64: 32, 128>}, {transform_indices = @transform_2, window_bounds = array<i64: 8, 128>}]} {
    %c0 = arith.constant 0 : index
    %c0_0 = arith.constant 0 : index
    %0 = vector.load %arg2[%c0, %c0_0] : memref<8x32xf32, #tpu.memory_space<vmem>>, vector<8x32xf32>
    %1 = arith.mulf %0, %0 : vector<8x32xf32>
    %cst = arith.constant dense<0.000000e+00> : vector<8xf32>
    %2 = vector.multi_reduction <add>, %1, %cst [1] : vector<8x32xf32> to vector<8xf32>
    %3 = vector.shape_cast %2 : vector<8xf32> to vector<8x1xf32>
    %cst_1 = arith.constant 1.000000e-30 : f32
    %4 = vector.broadcast %cst_1 : f32 to vector<8x1xf32>
    %5 = arith.maximumf %3, %4 : vector<8x1xf32>
    %6 = math.rsqrt %5 : vector<8x1xf32>
    %7 = vector.broadcast %6 : vector<8x1xf32> to vector<8x32xf32>
    %8 = arith.mulf %0, %7 : vector<8x32xf32>
    %c0_2 = arith.constant 0 : index
    %c0_3 = arith.constant 0 : index
    %9 = vector.load %arg3[%c0_2, %c0_3] : memref<32x128xf32, #tpu.memory_space<vmem>>, vector<32x128xf32>
    %cst_4 = arith.constant 1.000000e+00 : f32
    %10 = vector.broadcast %cst_4 : f32 to vector<8x32xf32>
    %11 = arith.mulf %9, %9 : vector<32x128xf32>
    %cst_5 = arith.constant dense<0.000000e+00> : vector<8x128xf32>
    %12 = tpu.matmul %10, %11, %cst_5 {dimension_numbers = #tpu.dot_dimension_numbers<[1], [0], [0], [1], [0, 0, 1, 1], [], []>} : vector<8x32xf32>, vector<32x128xf32>, vector<8x128xf32> -> vector<8x128xf32>
    %13 = vector.extract_strided_slice %12 {offsets = [0, 0], sizes = [1, 128], strides = [1, 1]} : vector<8x128xf32> to vector<1x128xf32>
    %cst_6 = arith.constant 1.000000e-30 : f32
    %14 = vector.broadcast %cst_6 : f32 to vector<1x128xf32>
    %15 = arith.maximumf %13, %14 : vector<1x128xf32>
    %16 = math.rsqrt %15 : vector<1x128xf32>
    %cst_7 = arith.constant 6.400000e+01 : f32
    %17 = vector.broadcast %cst_7 : f32 to vector<1x128xf32>
    %18 = arith.mulf %16, %17 : vector<1x128xf32>
    %cst_8 = arith.constant dense<0.000000e+00> : vector<8x128xf32>
    %19 = tpu.matmul %8, %9, %cst_8 {dimension_numbers = #tpu.dot_dimension_numbers<[1], [0], [0], [1], [0, 0, 1, 1], [], []>} : vector<8x32xf32>, vector<32x128xf32>, vector<8x128xf32> -> vector<8x128xf32>
    %20 = vector.broadcast %18 : vector<1x128xf32> to vector<8x128xf32>
    %21 = arith.mulf %19, %20 : vector<8x128xf32>
    %cst_9 = arith.constant -6.400000e+01 : f32
    %cst_10 = arith.constant 6.400000e+01 : f32
    %22 = vector.broadcast %cst_9 : f32 to vector<8x128xf32>
    %23 = arith.maximumf %22, %21 : vector<8x128xf32>
    %24 = vector.broadcast %cst_10 : f32 to vector<8x128xf32>
    %25 = arith.minimumf %24, %23 : vector<8x128xf32>
    %c0_11 = arith.constant 0 : index
    %c0_12 = arith.constant 0 : index
    %26 = vector.load %arg4[%c0_11, %c0_12] : memref<8x128xf32, #tpu.memory_space<vmem>>, vector<8x128xf32>
    tpu.vector_store %arg4[%c0_11, %c0_12], %25 {strides = array<i32>} : memref<8x128xf32, #tpu.memory_space<vmem>>, vector<8x128xf32>,
    return
  }
  func.func @transform_0(%arg0: i32, %arg1: i32) -> (i32, i32) {
    %c0_i32 = arith.constant 0 : i32
    %c0_i32_0 = arith.constant 0 : i32
    return %arg1, %c0_i32 : i32, i32
  }
  func.func @transform_1(%arg0: i32, %arg1: i32) -> (i32, i32) {
    %c0_i32 = arith.constant 0 : i32
    %c0_i32_0 = arith.constant 0 : i32
    return %c0_i32, %arg0 : i32, i32
  }
  func.func @transform_2(%arg0: i32, %arg1: i32) -> (i32, i32) {
    %c0_i32 = arith.constant 0 : i32
    return %arg1, %arg0 : i32, i32
  }
}

</mosaic_0001>

<bundles_post_ra>
// kernel: tpu_custom_call.1
= control target key start
LH: loop header
LB: loop body
LE: loop exit
PB: predicated region body
PF: predicated region fallthrough
CT: control target
= control target key end

     0   :  { %7 = vsyncpa [#allocation3], 0  ;;  %s941_s0 = inlined_call_operand.hbm [shape: f32[8,32], index: 0, kind: input, shape index: {}]   ;;  %s942_s1 = inlined_call_operand.hbm [shape: f32[32,512], index: 1, kind: input, shape index: {}]   ;;  %s943_s2 = inlined_call_operand.hbm [shape: f32[8,512], index: 2, kind: output, shape index: {}]  }
   0x1   :  { %8 = vsyncpa [#allocation6], 0 }
   0x2   :  { %10 = vsyncpa [#allocation6 + $0x1], 0 }
   0x3   :  { %11 = vsyncpa [#allocation4], 0 }
   0x4   :  { %13 = vsyncpa [#allocation4 + $0x1], 0  ;;  %s776_s9 = smov 0   ;;  %s778_s10 = smov 0  }
   0x5   :  { %s780_s11 = smov 0   ;;  %s782_s12 = smov 0  }
   0x6   :  { %s784_s13 = smov 0   ;;  %s786_s14 = smov 0  }
   0x7 LB: > { %s479_s15 = sadd.s32 4294967295, %s750_s14   ;;  %s480_s16 = sadd.s32 4294967294, %s750_s14   ;;  %s750_s14 = sphi %s786_s14, %s19_s14   ;;  %s746_s13 = sphi %s784_s13, %s961_s13   ;;  %s742_s12 = sphi %s782_s12, %s960_s12   ;;  %s738_s11 = sphi %s780_s11, %s959_s11   ;;  %s734_s10 = sphi %s778_s10, %s958_s10   ;;  %s730_s9 = sphi %s776_s9, %s957_s9  }
   0x8   : > { %s64_s17 = sadd.s32 1, %s738_s11  ;;  %p71_p0 = scmp.ne.s32.totalorder %s738_s11, %s734_s10 }
   0x9   : > { %p72_p1 = scmp.eq.s32.totalorder %s750_s14, 0  ;;  %p77_p2 = scmp.ne.s32.totalorder %s734_s10, %s730_s9 }
   0xa   : > { %p814_p3 = scmp.eq.s32.totalorder %s479_s15, 0  ;;  %p103_p4 = scmp.eq.s32.totalorder %s479_s15, 3 }
   0xb   : > { %p818_p5 = por %p72_p1, %p71_p0  ;;  %p109_p6 = scmp.eq.s32.totalorder %s480_s16, 3 }
   0xc   : > { %p824_p7 = por %p814_p3, %p77_p2  ;;  %p828_p8 = por %p103_p4, %p71_p0 }
   0xd   : > { %p832_p9 = por %p109_p6, %p77_p2  ;;  %p481_p10 = scmp.ge.s32.totalorder %s750_s14, 1 }
   0xe   : > { %s948_s20 = scalar_select %p824_p7, 1, 0 }
   0xf   : > { %s949_s21 = scalar_select %p828_p8, 1, 0 }
  0x10   : > { %s950_s22 = scalar_select %p832_p9, 1, 0 }
  0x11   : > { %p116_p11 = scmp.lt.s32.totalorder %s750_s14, 5  ;;  %s752_s24 = smov [#allocation2]  }
  0x12   : > { %s131_s25 = sshll.u32 %s752_s24, 4  ;;  %p550_p13 = scmp.lt.s32.totalorder %s750_s14, 4  ;;  %s132_s25 = int_to_ptr.vmem [resolvable:$true] %s131_s25 }
  0x13   : > { %p838_p12 = pnand %p481_p10, %p116_p11  ;;  %s31_s28 = sadd.s32 1, %s746_s13 }
  0x14   : > { %p847_p1 = pnand %p550_p13, %p818_p5  ;;  %p33_p4 = scmp.ge.s32.totalorder %s31_s28, 4 }
  0x15   : > { %p537_p0 = pneg %p838_p12  ;;  %s142_s29 = sand.u32 1, %s738_s11  }
  0x16   : > { %s623_s30 = scalar_lea.vmem %s132_s25, 128  ;;  %p631_p8 = scmp.lt.s32.totalorder %s132_s25, %s132_s25 }
  0x17   : > { %p853_p2 = pnand %p537_p0, %p814_p3  ;;  %p624_p10 = scmp.ne.s32.totalorder %s132_s25, %s623_s30 }
  0x18   : > { %p632_p5 = scmp.lt.s32.totalorder %s623_s30, %s623_s30 }
  0x19   : > { %p614_p6 = pneg %p853_p2 }
  0x1a   : > { %p633_p13 = por %p632_p5, %p631_p8 }
  0x1b   : > { %p626_p11 = pnand %p624_p10, %p614_p6 }
  0x1d   : > { %p627_p9 = pneg %p626_p11 }
  0x1f   : > { %p634_p7 = pnand %p633_p13, %p627_p9 }
  0x21   : > { %637 = shalt.err (!%p634_p7)
}
  0x22   : > { %540 = dma.hbm_to_vmem [thread:$0]  (!%p853_p2), %s941_s0, 128, %s132_s25, [#allocation3]  }
  0x23   : > { %s963_s28 = smov (%p33_p4, %s31_s28), 0  ;;  %s484_s5 = sshll.u32 %s142_s29, 5 }
  0x24   : > { %s61_s6 = ssub.s32 %s746_s13, %s963_s28  ;;  %s485_s7 = sshll.u32 %s746_s13, 7 }
  0x25   : > { %p62_p0 = scmp.eq.s32.totalorder %s61_s6, 0  ;;  %s151_s16 = scalar_lea.hbm %s942_s1, %s485_s7 }
  0x26   : > { %s146_s19 = scalar_lea.vmem [#allocation5], %s484_s5  ;;  %s143_s30 = scalar_lea.sflag [#allocation6], %s142_s29 }
  0x27   : > { %s152_s24 = sshll.u32 %s146_s19, 4  ;;  %p640_p7 = pneg %p847_p1  ;;  %s153_s24 = int_to_ptr.vmem [resolvable:$true] %s152_s24 }
  0x28   : > { %s877_s27 = scalar_select %p62_p0, %s738_s11, %s64_s17  }
  0x29   : > { %s651_s25 = scalar_lea.vmem %s153_s24, 512  ;;  %s753_s3 = smov [#allocation5]  }
  0x2a   : > { %p652_p8 = scmp.ne.s32.totalorder %s153_s24, %s651_s25  ;;  %s656_s4 = sshll.u32 %s753_s3, 4  ;;  %s657_s4 = int_to_ptr.vmem [resolvable:$false] %s656_s4 }
  0x2b   : > { %s658_s6 = scalar_lea.vmem %s657_s4, 1024  ;;  %p659_p4 = scmp.lt.s32.totalorder %s153_s24, %s657_s4 }
  0x2c   : > { %p654_p9 = pnand %p652_p8, %p640_p7  ;;  %p660_p6 = scmp.lt.s32.totalorder %s658_s6, %s651_s25 }
  0x2e   : > { %p655_p2 = pneg %p654_p9  ;;  %p661_p10 = por %p660_p6, %p659_p4 }
  0x30   : > { %p662_p11 = pnand %p661_p10, %p655_p2 }
  0x32   : > { %665 = shalt.err (!%p662_p11)
}
  0x33   : > { %s754_s5 = smov 512   ;;  %s755_s17 = smov 128  }
  0x34   : > { %s756_s7 = smov 8   ;;  %164 = sbr.rel (%p838_p12) target bundleno = 433 (0x1b1), region = 28 }
  0x35   : > { %544 = dma.hbm_to_vmem [thread:$0]  (!%p847_p1), %s151_s16, 512, %s153_s24, %s143_s30, %s754_s5, %s755_s17, %s756_s7  }
  0x39   : > { %717 = dma.done.wait (%p814_p3), [#allocation3], 128  }
  0x3a   : > { %719 = vsyncadd (%p814_p3), [#allocation3], 4294967168  ;;  %s890_s29 = sand.u32 1, %s734_s10   ;;  %p954_p5 = scmp.ne.s32.totalorder %s948_s20, 0 }
  0x3b   : > { %s488_s8 = sshll.u32 %s890_s29, 5  ;;  %s171_s15 = scalar_lea.sflag [#allocation6], %s890_s29 }
  0x3c   : > { %s174_s19 = scalar_lea.vmem [#allocation5], %s488_s8 }
  0x3d   : > { %721 = dma.done.wait (%p954_p5), %s171_s15, 512  }
  0x3e   : > { %723 = vsyncadd (%p954_p5), %s171_s15, 4294966784  ;;  %v757_v0 = vmov 0.0   ;;  %vm758_vm0 = vmmov 0   ;;  %v195_v1 = vld [vmem:[#allocation2] sm:$0xff]  ;;  %vm197_vm1 = vcmask 261120   ;;  %v206_v3 = vld [vmem:[%s174_s19 + $0x10] sm:$0xff]  ;;  %v361_v20 = vlaneseq }
  0x3f   : > { %507 = vmatprep.subr.mxu0 %v757_v0  ;;  %515 = vmatprep.mubr.msk.f32.mxu0 %vm758_vm0, %v757_v0  ;;  %v207_v2 = vld [vmem:[%s174_s19 + $0x18] sm:$0xff]  ;;  %v196_v4 = vmul.f32 %v195_v1, %v195_v1  ;;  %v210_v6 = vmul.f32 %v206_v3, %v206_v3  ;;  %v205_v7 = vld [vmem:[%s174_s19 + $0x8] sm:$0xff]  ;;  %v204_v8 = vld [vmem:[%s174_s19] sm:$0xff]  ;;  %v759_v12 = vmov 1.0   ;;  %s489_s18 = sshll.u32 %s890_s29, 3  ;;  %s494_s20 = sshll.u32 %s742_s12, 7 }
  0x40   : > { %518 = vmatprep.subr.mxu1 %v757_v0  ;;  %526 = vmatprep.mubr.msk.f32.mxu1 %vm758_vm0, %v757_v0  ;;  %v211_v5 = vmul.f32 %v207_v2, %v207_v2  ;;  %v209_v10 = vmul.f32 %v205_v7, %v205_v7  ;;  %v208_v11 = vmul.f32 %v204_v8, %v204_v8  ;;  %v362_v21 = vshrl.u32 %v361_v20, 7  ;;  %s194_s23 = scalar_lea.vmem [#allocation7], %s489_s18  ;;  %s383_s30 = scalar_lea.hbm %s943_s2, %s494_s20 }
  0x41   : > { %519 = vmatpush3.msra.mxu1 %v207_v2  ;;  %v198_v9 = vsel %vm197_vm1, %v196_v4, 0.0  ;;  %s385_s26 = sshll.u32 %s194_s23, 4  ;;  %s370_s25 = scalar_lea.sflag [#allocation4], %s890_s29  ;;  %s386_s26 = int_to_ptr.vmem [resolvable:$true] %s385_s26 }
  0x42   : > { %520 = vmatprep.subr.mxu1 %v757_v0  ;;  %508 = vmatpush3.msra.mxu0 %v211_v5  ;;  %v363_v24 = vsub.s32 0, %v362_v21  ;;  %s666_s3 = scalar_lea.vmem %s386_s26, 128  ;;  %p955_p12 = scmp.ne.s32.totalorder %s949_s21, 0 }
  0x43   : > { %521 = vmatpush3.msra.mxu1 %v206_v3  ;;  %199 = vadd.xlane.f32.xlu0 %v198_v9  ;;  %p667_p3 = scmp.ne.s32.totalorder %s386_s26, %s666_s3  ;;  %s760_s4 = smov [#allocation7]  }
  0x44   : > { %509 = vmatprep.subr.mxu0 %v757_v0  ;;  %522 = vmatprep.subr.mxu1 %v757_v0  ;;  %s670_s6 = sshll.u32 %s760_s4, 4  ;;  %s671_s6 = int_to_ptr.vmem [resolvable:$false] %s670_s6 }
  0x45   : > { %510 = vmatpush3.msra.mxu0 %v210_v6  ;;  %523 = vmatpush3.msra.mxu1 %v205_v7  ;;  %p668_p1 = pnand %p667_p3, %p955_p12  ;;  %s672_s12 = scalar_lea.vmem %s671_s6, 256 }
  0x46   : > { %511 = vmatprep.subr.mxu0 %v757_v0  ;;  %524 = vmatprep.subr.mxu1 %v757_v0  ;;  %p673_p0 = scmp.lt.s32.totalorder %s386_s26, %s671_s6  ;;  %p674_p7 = scmp.lt.s32.totalorder %s672_s12, %s666_s3 }
  0x47   : > { %512 = vmatpush3.msra.mxu0 %v209_v10  ;;  %525 = vmatpush3.msra.mxu1 %v204_v8  ;;  %p669_p13 = pneg %p668_p1 }
  0x48   : > { %513 = vmatprep.subr.mxu0 %v757_v0  ;;  %p675_p8 = por %p674_p7, %p673_p0 }
  0x49   : > { %514 = vmatpush3.msra.mxu0 %v208_v11 }
  0x4a   : > { %516 = vmatmul.mubr.msk.f32.vlgmr.msra.gmra.mxu0 %vm197_vm1, %v759_v12  ;;  %p676_p9 = pnand %p675_p8, %p669_p13 }
  0xcc   : > { %v200_v13 = vpop.xlane.xlu0 %199 }
  0xcd   : > { %v201_v14 = vmax.f32 %v200_v13, 1e-30 }
  0xcf   : > { %608 = vrsqrt.f32 %v201_v14 }
  0xdc   : > { %v609_v15 = vpop.eup %608 }
  0xdd   : > { %v203_v16 = vmul.f32 %v609_v15, %v195_v1 }
  0xdf   : > { %527 = vmatmul.mubr.msk.f32.vlgmr.msra.gmra.mxu1 %vm197_vm1, %v203_v16 }
 0x10a   : > { %v281_v17 = vpop.f32.mrf.mxu0 }
 0x10b   : > { %v285_v19 = vmax.f32 %v281_v17, 1e-30 }
 0x10c   : > { %v517_v18 = vpop.f32.mrf.mxu0 }
 0x10d   : > { %610 = vrsqrt.f32 %v285_v19 }
 0x11a   : > { %v611_v22 = vpop.eup %610 }
 0x11b   : > { %v287_v23 = vmul.f32 64.0, %v611_v22 }
 0x11d   : > { %v364_v25 = vrot.slane %v287_v23, %v363_v24 }
 0x19f   : > { %v357_v26 = vpop.f32.mrf.mxu1 }
 0x1a0   : > { %v365_v27 = vmul.f32 %v364_v25, %v357_v26 }
 0x1a1   : > { %v528_v28 = vpop.f32.mrf.mxu1 }
 0x1a2   : > { %v492_v29 = vclamps-f32 %v365_v27, 64.0 }
 0x1a4   : > { %368 = vst [vmem:[%s194_s23] sm:$0xff] %v492_v29 }
 0x1a5   : > { %679 = shalt.err (!%p676_p9)
}
 0x1a6   : > { %s680_s5 = scalar_lea.hbm %s383_s30, 128  ;;  %s684_s29 = scalar_lea.hbm %s943_s2, 512 }
 0x1a7   : > { %p681_p2 = scmp.ne.s32.totalorder %s383_s30, %s680_s5  ;;  %p685_p10 = scmp.lt.s32.totalorder %s383_s30, %s943_s2 }
 0x1a8   : > { %p686_p11 = scmp.lt.s32.totalorder %s684_s29, %s680_s5 }
 0x1a9   : > { %p682_p4 = pnand %p681_p2, %p955_p12 }
 0x1aa   : > { %p687_p5 = por %p686_p11, %p685_p10 }
 0x1ab   : > { %p683_p6 = pneg %p682_p4 }
 0x1ad   : > { %p688_p3 = pnand %p687_p5, %p683_p6 }
 0x1af   : > { %691 = shalt.err (!%p688_p3)
}
 0x1b0   : > { %535 = dma.vmem_to_hbm [thread:$0]  (%p955_p12), %s386_s26, 128, %s383_s30, %s370_s25  }
 0x1b1 PF: > { %p552_p1 = scmp.ge.s32.totalorder %s750_s14, 2  ;;  %s397_s19 = sand.u32 1, %s730_s9  }
 0x1b2   : > { %p956_p13 = scmp.ne.s32.totalorder %s950_s22, 0  ;;  %s398_s18 = scalar_lea.sflag [#allocation4], %s397_s19 }
 0x1b4   : > { %p546_p0 = pnand %p552_p1, %p956_p13 }
 0x1b6   : > { %p547_p7 = pneg %p546_p0 }
 0x1b8   : > { %725 = dma.done.wait (%p547_p7), %s398_s18, 128  }
 0x1b9   : > { %727 = vsyncadd (%p547_p7), %s398_s18, 4294967168  ;;  %s19_s14 = sadd.s32 1, %s750_s14   ;;  %s957_s9 = smov %s734_s10 }
 0x1ba   : > { %p16_p8 = scmp.ge.s32.totalorder %s19_s14, 6   ;;  %s958_s10 = smov %s738_s11 }
 0x1bb   : > { %s959_s11 = smov %s877_s27  ;;  %s960_s12 = smov %s746_s13 }
 0x1bc   : > { %s961_s13 = smov %s963_s28  ;;  %18 = sbr.rel (!%p16_p8) target bundleno = 7 (0x7), region = 79 }
 0x1c1   :  { %403 = vsyncpa [#allocation3], 1 }
 0x1c2   :  { %405 = vsyncpa [#allocation3 + $0x1], 1 }
 0x1c3   :  { %406 = vsyncpa [#allocation6], 1 }
 0x1c4   :  { %408 = vsyncpa [#allocation6 + $0x1], 1 }
 0x1c5   :  { %409 = vsyncpa [#allocation4], 1 }
 0x1c6   :  { %411 = vsyncpa [#allocation4 + $0x1], 1 }

</bundles_post_ra>
